<compile_context>
chip_gen: v6e
topology: v6e:2x2x1
jax: 0.10.0
libtpu: 0.0.40
codegen_flags: <defaults>
</compile_context>

<pallas_src>
import math

import jax
import jax.numpy as jnp
from jax.experimental import pallas as pl
from jax.experimental.pallas import tpu as pltpu


def _pointwise_conv_kernel(x_ref, w_ref, b_ref, o_ref):
    # x_ref: (TM, P*C_in) tile, w_ref: (P*C_in, P*C_out) block-diagonal,
    # b_ref: (1, P*C_out) tiled bias.  Dense MXU matmul + VPU bias add.
    acc = jnp.dot(x_ref[...], w_ref[...], preferred_element_type=jnp.float32)
    o_ref[...] = (acc + b_ref[...]).astype(o_ref.dtype)


def _choose_pack(c_in, c_out):
    """Smallest pixels-per-row packing factor P such that both the packed
    contraction width (P*C_in) and the packed output width (P*C_out) are
    lane-dense multiples of 128.  C_in=4 / C_out=8  ->  P=32 (128 / 256 lanes),
    which minimizes the block-diagonal MXU waste while avoiding masked
    vst.msk partial stores."""
    p_in = 128 // math.gcd(c_in, 128)
    p_out = 128 // math.gcd(c_out, 128)
    return math.lcm(p_in, p_out)


def _row_tile(rows, tm):
    """Row-tile (second-to-last block dim).  Multiple of 8 on the multi-block
    path; when a single block would cover everything, split into two blocks
    if there is enough work so the DMA pipeline and both v7x TensorCores get
    used, otherwise use the full extent (always a legal block shape)."""
    tm = max(8, (tm // 8) * 8)                 # (8,128) rule robustness
    if rows > tm:
        return tm
    if rows >= 1024:                           # enough work: force even grid of 2
        return (((rows + 1) // 2) + 7) // 8 * 8
    return rows


def my_conv_forward(x, weight, bias, *, tm=4096):
    """Pointwise (kernel_size=1) conv: out[b,h,w,:] = W @ x[b,h,w,:] + bias.

    x: (B, H, W, C_in) NHWC.  weight: (C_out, C_in).  bias: (C_out,).
    """
    B, H, W, C_in = x.shape
    C_out = weight.shape[0]
    M = B * H * W
    dtype = x.dtype

    P = _choose_pack(C_in, C_out)
    k_lanes = P * C_in
    n_lanes = P * C_out

    # ---- pack pixels into lanes (contiguous reshape: no HBM copy) ----------
    x2d = x.reshape(M, C_in)
    tail = M % P
    if tail:
        # Rare path: only pad the sub-P pixel tail so the packed reshape is
        # legal.  (Common shapes with H*W a multiple of 32 skip this copy.)
        x2d = jnp.pad(x2d, ((0, P - tail), (0, 0)))
    rows = x2d.shape[0] // P
    x_packed = x2d.reshape(rows, k_lanes)

    # Block-diagonal weight: W_bd[p*C_in + c, p*C_out + o] = W[o, c]
    w_bd = jnp.kron(jnp.eye(P, dtype=dtype), weight.T.astype(dtype))
    b_tiled = jnp.tile(bias.astype(dtype), P).reshape(1, n_lanes)

    # ---- row tiling: no row padding; Pallas masks the partial last block ---
    tm_eff = _row_tile(rows, tm)
    grid = (pl.cdiv(rows, tm_eff),)

    out_packed = pl.pallas_call(
        _pointwise_conv_kernel,
        out_shape=jax.ShapeDtypeStruct((rows, n_lanes), dtype),
        grid_spec=pltpu.PrefetchScalarGridSpec(
            num_scalar_prefetch=0,
            grid=grid,
            in_specs=[
                pl.BlockSpec((tm_eff, k_lanes), lambda i: (i, 0)),
                pl.BlockSpec((k_lanes, n_lanes), lambda i: (0, 0)),  # resident
                pl.BlockSpec((1, n_lanes), lambda i: (0, 0)),        # resident
            ],
            out_specs=pl.BlockSpec((tm_eff, n_lanes), lambda i: (i, 0)),
        ),
        compiler_params=pltpu.CompilerParams(
            dimension_semantics=("parallel",),
            # 32 MiB: lifts v5e's 16 MiB scoped default, leaves headroom on
            # v7x's 64 MiB physical VMEM.  (On v6e this could go to 64 MiB.)
            vmem_limit_bytes=32 * 1024 * 1024,
        ),
    )(x_packed, w_bd, b_tiled)

    # Unpack lanes back to channels (free contiguous reshape).
    out2d = out_packed.reshape(rows * P, C_out)
    if tail:
        out2d = out2d[:M]          # only when the pixel-tail pad was taken
    return out2d.reshape(B, H, W, C_out)


def init_params(key, input_dim, output_dim, kernel_size=1):
    """Deterministic init matching nn.Conv2d + kaiming_normal_(fan_in, leaky_relu)."""
    kw, kb = jax.random.split(key)
    fan_in = input_dim * kernel_size * kernel_size
    gain = math.sqrt(2.0 / (1.0 + 0.01 ** 2))  # leaky_relu, negative_slope=0.01
    std = gain / math.sqrt(fan_in)
    weight = std * jax.random.normal(kw, (output_dim, input_dim), dtype=jnp.float32)
    bound = 1.0 / math.sqrt(fan_in)
    bias = jax.random.uniform(kb, (output_dim,), minval=-bound, maxval=bound,
                              dtype=jnp.float32)
    return weight, bias


if __name__ == "__main__":
    key = jax.random.PRNGKey(0)
    k_x, k_p, k_x2, k_x3 = jax.random.split(key, 4)

    # Small shape consistent with the module: NHWC input, C_in=4, C_out=8.
    B, H, W = 2, 16, 16
    input_dim, output_dim = 4, 8

    x = jax.random.normal(k_x, (B, H, W, input_dim), dtype=jnp.float32)
    weight, bias = init_params(k_p, input_dim, output_dim, kernel_size=1)

    out = jax.block_until_ready(my_conv_forward(x, weight, bias))
    ref = jnp.einsum("bhwc,oc->bhwo", x, weight) + bias
    assert out.shape == (B, H, W, output_dim)
    assert jnp.allclose(out, ref, atol=1e-5, rtol=1e-5)

    # Multi-block path with a partial (masked) last block, no row padding.
    x2 = jax.random.normal(k_x2, (1, 128, 96, input_dim), dtype=jnp.float32)
    out2 = jax.block_until_ready(my_conv_forward(x2, weight, bias, tm=80))
    ref2 = jnp.einsum("bhwc,oc->bhwo", x2, weight) + bias
    assert jnp.allclose(out2, ref2, atol=1e-5, rtol=1e-5)

    # Pixel-tail path (M % P != 0).
    x3 = jax.random.normal(k_x3, (1, 10, 10, input_dim), dtype=jnp.float32)
    out3 = jax.block_until_ready(my_conv_forward(x3, weight, bias))
    ref3 = jnp.einsum("bhwc,oc->bhwo", x3, weight) + bias
    assert jnp.allclose(out3, ref3, atol=1e-5, rtol=1e-5)

    print("KERNEL_OK")
</pallas_src>

<mosaic_0001>
module attributes {stable_mosaic.version = 11 : i64} {
  func.func @_pointwise_conv_kernel(%arg0: i32, %arg1: memref<16x128xf32, #tpu.memory_space<vmem>>, %arg2: memref<128x256xf32, #tpu.memory_space<vmem>>, %arg3: memref<1x256xf32, #tpu.memory_space<vmem>>, %arg4: memref<16x256xf32, #tpu.memory_space<vmem>>) attributes {dimension_semantics = [#tpu.dimension_semantics<parallel>], iteration_bounds = array<i64: 1>, scalar_prefetch = 0 : i64, scratch_operands = 0 : i64, tpu.core_type = #tpu.core_type<tc>, window_params = [{transform_indices = @transform_0, window_bounds = array<i64: 16, 128>}, {pipeline_mode = #tpu.pipeline_mode<synchronous>, transform_indices = @transform_1, window_bounds = array<i64: 128, 256>}, {pipeline_mode = #tpu.pipeline_mode<synchronous>, transform_indices = @transform_2, window_bounds = array<i64: 1, 256>}, {transform_indices = @transform_3, window_bounds = array<i64: 16, 256>}]} {
    %c0 = arith.constant 0 : index
    %c0_0 = arith.constant 0 : index
    %0 = vector.load %arg1[%c0, %c0_0] : memref<16x128xf32, #tpu.memory_space<vmem>>, vector<16x128xf32>
    %c0_1 = arith.constant 0 : index
    %c0_2 = arith.constant 0 : index
    %1 = vector.load %arg2[%c0_1, %c0_2] : memref<128x256xf32, #tpu.memory_space<vmem>>, vector<128x256xf32>
    %cst = arith.constant dense<0.000000e+00> : vector<16x256xf32>
    %2 = tpu.matmul %0, %1, %cst {dimension_numbers = #tpu.dot_dimension_numbers<[1], [0], [0], [1], [0, 0, 1, 1], [], []>} : vector<16x128xf32>, vector<128x256xf32>, vector<16x256xf32> -> vector<16x256xf32>
    %c0_3 = arith.constant 0 : index
    %c0_4 = arith.constant 0 : index
    %3 = vector.load %arg3[%c0_3, %c0_4] : memref<1x256xf32, #tpu.memory_space<vmem>>, vector<1x256xf32>
    %4 = vector.broadcast %3 : vector<1x256xf32> to vector<16x256xf32>
    %5 = arith.addf %2, %4 : vector<16x256xf32>
    %c0_5 = arith.constant 0 : index
    %c0_6 = arith.constant 0 : index
    %6 = vector.load %arg4[%c0_5, %c0_6] : memref<16x256xf32, #tpu.memory_space<vmem>>, vector<16x256xf32>
    tpu.vector_store %arg4[%c0_5, %c0_6], %5 {strides = array<i32>} : memref<16x256xf32, #tpu.memory_space<vmem>>, vector<16x256xf32>,
    return
  }
  func.func @transform_0(%arg0: i32) -> (i32, i32) {
    %c0_i32 = arith.constant 0 : i32
    %c0_i32_0 = arith.constant 0 : i32
    return %arg0, %c0_i32 : i32, i32
  }
  func.func @transform_1(%arg0: i32) -> (i32, i32) {
    %c0_i32 = arith.constant 0 : i32
    %c0_i32_0 = arith.constant 0 : i32
    %c0_i32_1 = arith.constant 0 : i32
    return %c0_i32, %c0_i32_0 : i32, i32
  }
  func.func @transform_2(%arg0: i32) -> (i32, i32) {
    %c0_i32 = arith.constant 0 : i32
    %c0_i32_0 = arith.constant 0 : i32
    %c0_i32_1 = arith.constant 0 : i32
    return %c0_i32, %c0_i32_0 : i32, i32
  }
  func.func @transform_3(%arg0: i32) -> (i32, i32) {
    %c0_i32 = arith.constant 0 : i32
    %c0_i32_0 = arith.constant 0 : i32
    return %arg0, %c0_i32 : i32, i32
  }
}

</mosaic_0001>

<bundles_post_ra>
// kernel: tpu_custom_call.1
= control target key start
LH: loop header
LB: loop body
LE: loop exit
PB: predicated region body
PF: predicated region fallthrough
CT: control target
= control target key end

     0   :  { %8 = vsyncpa [#allocation3], 0  ;;  %s340_s0 = inlined_call_operand.hbm [shape: f32[16,128], index: 0, kind: input, shape index: {}]   ;;  %s341_s1 = inlined_call_operand.hbm [shape: f32[128,256], index: 1, kind: input, shape index: {}]   ;;  %s342_s2 = inlined_call_operand.vmem [shape: f32[1,256], index: 2, kind: input, shape index: {}]   ;;  %s343_s3 = inlined_call_operand.hbm [shape: f32[16,256], index: 3, kind: output, shape index: {}]  }
   0x1   :  { %9 = vsyncpa [#allocation6], 0 }
   0x2   :  { %10 = vsyncpa [#allocation4], 0  ;;  %s294_s12 = smov [#allocation2]  }
   0x3   :  { %s16_s13 = sshll.u32 %s294_s12, 4  ;;  %s17_s13 = int_to_ptr.vmem [resolvable:$true] %s16_s13 }
   0x4   :  { %s236_s14 = scalar_lea.vmem %s17_s13, 256  ;;  %p241_p1 = scmp.lt.s32.totalorder %s17_s13, %s17_s13 }
   0x5   :  { %p237_p0 = scmp.ne.s32.totalorder %s17_s13, %s236_s14  ;;  %p242_p2 = scmp.lt.s32.totalorder %s236_s14, %s236_s14 }
   0x7   :  { %p243_p3 = por %p242_p2, %p241_p1 }
   0x9   :  { %p244_p4 = pnand %p243_p3, %p237_p0 }
   0xb   :  { %247 = shalt.err (!%p244_p4)
}
   0xc   :  { %s295_s15 = smov 128   ;;  %s296_s16 = smov 8  }
   0xd   :  { %22 = dma.hbm_to_vmem [thread:$0]  %s340_s0, 256, %s17_s13, [#allocation3], %s295_s15, %s295_s15, %s296_s16  }
   0xe   :  { %s297_s19 = smov [#allocation5]  }
   0xf   :  { %s28_s20 = sshll.u32 %s297_s19, 4  ;;  %s29_s20 = int_to_ptr.vmem [resolvable:$true] %s28_s20 }
  0x10   :  { %s256_s21 = scalar_lea.vmem %s29_s20, 4096  ;;  %p261_p6 = scmp.lt.s32.totalorder %s29_s20, %s29_s20 }
  0x11   :  { %p257_p5 = scmp.ne.s32.totalorder %s29_s20, %s256_s21  ;;  %p262_p7 = scmp.lt.s32.totalorder %s256_s21, %s256_s21 }
  0x13   :  { %p263_p8 = por %p262_p7, %p261_p6 }
  0x15   :  { %p264_p9 = pnand %p263_p8, %p257_p5 }
  0x17   :  { %267 = shalt.err (!%p264_p9)
}
  0x18   :  { %s298_s22 = smov 256   ;;  %s299_s23 = smov 16  }
  0x19   :  { %34 = dma.hbm_to_vmem [thread:$0]  %s341_s1, 4096, %s29_s20, [#allocation6], %s298_s22, %s298_s22, %s299_s23  }
  0x1a   :  { %288 = dma.done.wait [#allocation3], 256  }
  0x1b   :  { %289 = vsyncadd [#allocation3], 4294967040 }
  0x1c   :  { %290 = dma.done.wait [#allocation6], 4096  }
  0x1d   :  { %291 = vsyncadd [#allocation6], 4294963200  ;;  %v300_v0 = vmov 0.0   ;;  %v76_v1 = vld [vmem:[#allocation5 + $0xf8] sm:$0xff]  ;;  %v75_v2 = vld [vmem:[#allocation5 + $0xf0] sm:$0xff]  ;;  %v79_v35 = vlaneseq  ;;  %s301_s26 = smov [#allocation7]  }
  0x1e   :  { %153 = vmatprep.mubr.f32.mxu0 %v300_v0  ;;  %159 = vmatprep.mubr.f32.mxu1 %v300_v0  ;;  %v74_v3 = vld [vmem:[#allocation5 + $0xe8] sm:$0xff]  ;;  %v73_v4 = vld [vmem:[#allocation5 + $0xe0] sm:$0xff]  ;;  %v72_v5 = vld [vmem:[#allocation5 + $0xd8] sm:$0xff]  ;;  %s175_s27 = sshll.u32 %s301_s26, 4  ;;  %s176_s27 = int_to_ptr.vmem [resolvable:$true] %s175_s27 }
  0x1f   :  { %89 = vmatprep.subr.mxu0 %v76_v1  ;;  %188 = vmatprep.subr.mxu1 %v76_v1  ;;  %v71_v6 = vld [vmem:[#allocation5 + $0xd0] sm:$0xff]  ;;  %v70_v7 = vld [vmem:[#allocation5 + $0xc8] sm:$0xff]  ;;  %v69_v8 = vld [vmem:[#allocation5 + $0xc0] sm:$0xff]  ;;  %v80_v36 = vshrl.u32 %v79_v35, 7  ;;  %s268_s28 = scalar_lea.vmem %s176_s27, 512  ;;  %p273_p11 = scmp.lt.s32.totalorder %s176_s27, %s176_s27 }
  0x20   :  { %90 = vmatpush1.msra.mxu0 %v75_v2  ;;  %204 = vmatpush1.msra.mxu1 %v75_v2  ;;  %v68_v9 = vld [vmem:[#allocation5 + $0xb8] sm:$0xff]  ;;  %v67_v10 = vld [vmem:[#allocation5 + $0xb0] sm:$0xff]  ;;  %v66_v11 = vld [vmem:[#allocation5 + $0xa8] sm:$0xff]  ;;  %p269_p10 = scmp.ne.s32.totalorder %s176_s27, %s268_s28  ;;  %p274_p12 = scmp.lt.s32.totalorder %s268_s28, %s268_s28 }
  0x21   :  { %91 = vmatprep.subr.mxu0 %v74_v3  ;;  %189 = vmatprep.subr.mxu1 %v74_v3  ;;  %v65_v12 = vld [vmem:[#allocation5 + $0xa0] sm:$0xff]  ;;  %v64_v13 = vld [vmem:[#allocation5 + $0x98] sm:$0xff]  ;;  %v63_v14 = vld [vmem:[#allocation5 + $0x90] sm:$0xff]  ;;  %v81_v37 = vsub.s32 0, %v80_v36  ;;  %v85_v39 = vsub.s32 1, %v80_v36 }
  0x22   :  { %92 = vmatpush1.msra.mxu0 %v73_v4  ;;  %205 = vmatpush1.msra.mxu1 %v73_v4  ;;  %v62_v15 = vld [vmem:[#allocation5 + $0x88] sm:$0xff]  ;;  %v61_v16 = vld [vmem:[#allocation5 + $0x80] sm:$0xff]  ;;  %v60_v17 = vld [vmem:[#allocation5 + $0x78] sm:$0xff]  ;;  %p275_p13 = por %p274_p12, %p273_p11 }
  0x23   :  { %93 = vmatprep.subr.mxu0 %v72_v5  ;;  %190 = vmatprep.subr.mxu1 %v72_v5  ;;  %v59_v18 = vld [vmem:[#allocation5 + $0x70] sm:$0xff]  ;;  %v58_v19 = vld [vmem:[#allocation5 + $0x68] sm:$0xff]  ;;  %v57_v20 = vld [vmem:[#allocation5 + $0x60] sm:$0xff] }
  0x24   :  { %94 = vmatpush1.msra.mxu0 %v71_v6  ;;  %206 = vmatpush1.msra.mxu1 %v71_v6  ;;  %v56_v21 = vld [vmem:[#allocation5 + $0x58] sm:$0xff]  ;;  %v55_v22 = vld [vmem:[#allocation5 + $0x50] sm:$0xff]  ;;  %v54_v23 = vld [vmem:[#allocation5 + $0x48] sm:$0xff]  ;;  %p276_p0 = pnand %p275_p13, %p269_p10 }
  0x25   :  { %95 = vmatprep.subr.mxu0 %v70_v7  ;;  %191 = vmatprep.subr.mxu1 %v70_v7  ;;  %v53_v24 = vld [vmem:[#allocation5 + $0x40] sm:$0xff]  ;;  %v52_v25 = vld [vmem:[#allocation5 + $0x38] sm:$0xff]  ;;  %v51_v26 = vld [vmem:[#allocation5 + $0x30] sm:$0xff] }
  0x26   :  { %96 = vmatpush1.msra.mxu0 %v69_v8  ;;  %207 = vmatpush1.msra.mxu1 %v69_v8  ;;  %v50_v27 = vld [vmem:[#allocation5 + $0x28] sm:$0xff]  ;;  %v49_v28 = vld [vmem:[#allocation5 + $0x20] sm:$0xff]  ;;  %v48_v29 = vld [vmem:[#allocation5 + $0x18] sm:$0xff] }
  0x27   :  { %97 = vmatprep.subr.mxu0 %v68_v9  ;;  %192 = vmatprep.subr.mxu1 %v68_v9  ;;  %v47_v30 = vld [vmem:[#allocation5 + $0x10] sm:$0xff]  ;;  %v46_v31 = vld [vmem:[#allocation5 + $0x8] sm:$0xff]  ;;  %v45_v32 = vld [vmem:[#allocation5] sm:$0xff] }
  0x28   :  { %98 = vmatpush1.msra.mxu0 %v67_v10  ;;  %208 = vmatpush1.msra.mxu1 %v67_v10  ;;  %v43_v33 = vld [vmem:[#allocation2] sm:$0xff]  ;;  %v44_v34 = vld [vmem:[#allocation2 + $0x8] sm:$0xff] }
  0x29   :  { %99 = vmatprep.subr.mxu0 %v66_v11  ;;  %193 = vmatprep.subr.mxu1 %v66_v11  ;;  %v77_v38 = vld [vmem:[%s342_s2] sm:$0x3] }
  0x2a   :  { %100 = vmatpush1.msra.mxu0 %v65_v12  ;;  %209 = vmatpush1.msra.mxu1 %v65_v12  ;;  %v82_v40 = vrot.slane %v77_v38, %v81_v37  ;;  %v86_v41 = vrot.slane %v77_v38, %v85_v39 }
  0x2b   :  { %101 = vmatprep.subr.mxu0 %v64_v13  ;;  %194 = vmatprep.subr.mxu1 %v64_v13 }
  0x2c   :  { %102 = vmatpush1.msra.mxu0 %v63_v14  ;;  %210 = vmatpush1.msra.mxu1 %v63_v14 }
  0x2d   :  { %103 = vmatprep.subr.mxu0 %v62_v15  ;;  %195 = vmatprep.subr.mxu1 %v62_v15 }
  0x2e   :  { %104 = vmatpush1.msra.mxu0 %v61_v16  ;;  %211 = vmatpush1.msra.mxu1 %v61_v16 }
  0x2f   :  { %105 = vmatprep.subr.mxu0 %v60_v17  ;;  %196 = vmatprep.subr.mxu1 %v60_v17 }
  0x30   :  { %106 = vmatpush1.msra.mxu0 %v59_v18  ;;  %212 = vmatpush1.msra.mxu1 %v59_v18 }
  0x31   :  { %107 = vmatprep.subr.mxu0 %v58_v19  ;;  %197 = vmatprep.subr.mxu1 %v58_v19 }
  0x32   :  { %108 = vmatpush1.msra.mxu0 %v57_v20  ;;  %213 = vmatpush1.msra.mxu1 %v57_v20 }
  0x33   :  { %109 = vmatprep.subr.mxu0 %v56_v21  ;;  %198 = vmatprep.subr.mxu1 %v56_v21 }
  0x34   :  { %110 = vmatpush1.msra.mxu0 %v55_v22  ;;  %214 = vmatpush1.msra.mxu1 %v55_v22 }
  0x35   :  { %111 = vmatprep.subr.mxu0 %v54_v23  ;;  %199 = vmatprep.subr.mxu1 %v54_v23 }
  0x36   :  { %112 = vmatpush1.msra.mxu0 %v53_v24  ;;  %215 = vmatpush1.msra.mxu1 %v53_v24 }
  0x37   :  { %113 = vmatprep.subr.mxu0 %v52_v25  ;;  %200 = vmatprep.subr.mxu1 %v52_v25 }
  0x38   :  { %114 = vmatpush1.msra.mxu0 %v51_v26  ;;  %216 = vmatpush1.msra.mxu1 %v51_v26 }
  0x39   :  { %115 = vmatprep.subr.mxu0 %v50_v27  ;;  %201 = vmatprep.subr.mxu1 %v50_v27 }
  0x3a   :  { %116 = vmatpush1.msra.mxu0 %v49_v28  ;;  %217 = vmatpush1.msra.mxu1 %v49_v28 }
  0x3b   :  { %117 = vmatprep.subr.mxu0 %v48_v29  ;;  %202 = vmatprep.subr.mxu1 %v48_v29 }
  0x3c   :  { %118 = vmatpush1.msra.mxu0 %v47_v30  ;;  %218 = vmatpush1.msra.mxu1 %v47_v30 }
  0x3d   :  { %119 = vmatprep.subr.mxu0 %v46_v31  ;;  %203 = vmatprep.subr.mxu1 %v46_v31 }
  0x3e   :  { %120 = vmatpush1.msra.mxu0 %v45_v32  ;;  %219 = vmatpush1.msra.mxu1 %v45_v32 }
  0x3f   :  { %154 = vmatmul.mubr.f32.vlgmr.msra.gmra.mxu0 %v43_v33  ;;  %160 = vmatmul.mubr.f32.vlgmr.msra.gmra.mxu1 %v44_v34 }
  0xff   :  { %v155_v42 = vpop.f32.mrf.mxu0  ;;  %v161_v43 = vpop.f32.mrf.mxu1 }
 0x100   :  { %v156_v44 = vadd.f32 %v155_v42, %v82_v40  ;;  %v162_v45 = vadd.f32 %v161_v43, %v82_v40 }
 0x101   :  { %v157_v46 = vpop.f32.mrf.mxu0  ;;  %v163_v47 = vpop.f32.mrf.mxu1 }
 0x102   :  { %166 = vst [vmem:[#allocation7] sm:$0xff] %v156_v44  ;;  %168 = vst [vmem:[#allocation7 + $0x10] sm:$0xff] %v162_v45  ;;  %v158_v48 = vadd.f32 %v157_v46, %v86_v41  ;;  %v164_v49 = vadd.f32 %v163_v47, %v86_v41 }
 0x104   :  { %167 = vst [vmem:[#allocation7 + $0x8] sm:$0xff] %v158_v48  ;;  %169 = vst [vmem:[#allocation7 + $0x18] sm:$0xff] %v164_v49 }
 0x105   :  { %279 = shalt.err (!%p276_p0)
}
 0x106   :  { %181 = dma.vmem_to_hbm [thread:$0]  %s176_s27, 512, %s343_s3, [#allocation4], %s298_s22, %s298_s22, %s299_s23  }
 0x107   :  { %292 = dma.done.wait [#allocation4], 512  }
 0x108   :  { %293 = vsyncadd [#allocation4], 4294966784 }
 0x109   :  { %185 = vsyncpa [#allocation3], 1 }
 0x10a   :  { %186 = vsyncpa [#allocation6], 1 }
 0x10b   :  { %187 = vsyncpa [#allocation4], 1 }

</bundles_post_ra>
